<compile_context>
chip_gen: v7x
topology: tpu7x:2x2x1
jax: 0.10.0
libtpu: 0.0.40
codegen_flags: <defaults>
</compile_context>

<pallas_src>
import jax
import jax.numpy as jnp
from jax import lax
from jax.experimental import pallas as pl
from jax.experimental.pallas import tpu as pltpu


def _round_up(x, m):
    return (x + m - 1) // m * m


def _pick_tile(dim, pref, align):
    # full (alignment-rounded) dim when small, preferred tile when large
    return pref if dim >= pref else _round_up(dim, align)


def _pad2(a, rows, cols):
    pr, pc = rows - a.shape[0], cols - a.shape[1]
    if pr or pc:
        a = jnp.pad(a, ((0, pr), (0, pc)))
    return a


def fused_linear_kernel(x_ref, w_ref, qa_ref, qb_ref, tkw_ref, e_ref,
                        o_ref, acc_ref, a_ref):
    # x_ref:   (TM, TK)   activations tile
    # w_ref:   (TN, TK)   fused weight tile, native (Hout, Hin) layout
    # qa_ref:  (KR, TK)   all adapters' down-proj, rows ordered (k, r)
    # qb_ref:  (KR, TN)   all adapters' up-proj, pre-scaled by scaling_factor
    # tkw_ref: (TM, K)    per-example gate weights
    # e_ref:   (K, KR)    constant expansion: (tkw @ E)[b, k*R + r] == tkw[b, k]
    # o_ref:   (TM, TN)   output tile
    # acc_ref: (TM, TN) f32 scratch; a_ref: (TM, KR) f32 scratch
    k = pl.program_id(2)

    @pl.when(k == 0)
    def _init():
        acc_ref[...] = jnp.zeros_like(acc_ref)
        a_ref[...] = jnp.zeros_like(a_ref)

    x = x_ref[...]
    # main path: x @ W.T  (contract the Hin tile of both operands)
    acc_ref[...] += lax.dot_general(
        x, w_ref[...], (((1,), (1,)), ((), ())),
        preferred_element_type=jnp.float32)
    # adapter down-projection partials: (TM, KR)
    a_ref[...] += lax.dot_general(
        x, qa_ref[...], (((1,), (1,)), ((), ())),
        preferred_element_type=jnp.float32)

    @pl.when(k == pl.num_programs(2) - 1)
    def _finalize():
        # gate on the rank dimension AFTER the full Hin reduction of 'a'
        gate = jnp.dot(tkw_ref[...].astype(jnp.float32), e_ref[...],
                       preferred_element_type=jnp.float32)            # (TM, KR)
        a_gated = (a_ref[...] * gate).astype(qb_ref.dtype)
        mix = jnp.dot(a_gated, qb_ref[...],
                      preferred_element_type=jnp.float32)             # (TM, TN)
        o_ref[...] = (acc_ref[...] + mix).astype(o_ref.dtype)


def fused_linear(x, fused_weight, qa_weights, qb_weights, top_k_weights,
                 scaling_factor, *, compute_dtype=None):
    """x: (B, Hin); fused_weight: (Hout, Hin); qa: (K, R, Hin); qb: (K, Hout, R);
    top_k_weights: (B, K); scaling_factor: (Hout,)  ->  (B, Hout)"""
    B, Hin = x.shape
    Hout = fused_weight.shape[0]
    K, R, _ = qa_weights.shape
    KR = K * R
    out_dtype = x.dtype

    if compute_dtype is not None:  # e.g. jnp.bfloat16 for full MXU rate on v6e/v7x
        x = x.astype(compute_dtype)
        fused_weight = fused_weight.astype(compute_dtype)
        qa_weights = qa_weights.astype(compute_dtype)
        qb_weights = qb_weights.astype(compute_dtype)

    # Flatten the K adapters into two lane-dense matmul operands.
    qa_all = qa_weights.reshape(KR, Hin)                          # row k*R+r = qa[k, r, :]
    qb_all = jnp.swapaxes(qb_weights, 1, 2).reshape(KR, Hout)     # row k*R+r = qb[k, :, r]
    # Fold scaling_factor into qb (exact: scaling multiplies only the mixture term).
    qb_all = qb_all * scaling_factor[None, :].astype(qb_all.dtype)

    # Gate-expansion constant: column k*R + r of E is e_k.
    e_mat = jnp.repeat(jnp.eye(K, dtype=jnp.float32), R, axis=1)  # (K, KR)

    # Tile sizes: preferred MXU-sized tiles for large dims, full (aligned) dim when small.
    TM = _pick_tile(B, 256, 8)
    TN = _pick_tile(Hout, 512, 128)   # lane-dense output stores
    TK = _pick_tile(Hin, 512, 128)

    Bp, Houtp, Hinp = _round_up(B, TM), _round_up(Hout, TN), _round_up(Hin, TK)
    xp = _pad2(x, Bp, Hinp)                       # zero Hin padding contributes nothing
    wp = _pad2(fused_weight, Houtp, Hinp)
    qap = _pad2(qa_all, KR, Hinp)
    qbp = _pad2(qb_all, KR, Houtp)
    tkwp = _pad2(top_k_weights, Bp, K)

    grid = (Bp // TM, Houtp // TN, Hinp // TK)

    out = pl.pallas_call(
        fused_linear_kernel,
        out_shape=jax.ShapeDtypeStruct((Bp, Houtp), out_dtype),
        grid_spec=pltpu.PrefetchScalarGridSpec(
            num_scalar_prefetch=0,
            grid=grid,
            in_specs=[
                pl.BlockSpec((TM, TK), lambda i, j, k: (i, k)),   # x
                pl.BlockSpec((TN, TK), lambda i, j, k: (j, k)),   # fused weight (Hout,Hin)
                pl.BlockSpec((KR, TK), lambda i, j, k: (0, k)),   # qa_all
                pl.BlockSpec((KR, TN), lambda i, j, k: (0, j)),   # qb_all (pre-scaled)
                pl.BlockSpec((TM, K), lambda i, j, k: (i, 0)),    # top_k_weights
                pl.BlockSpec((K, KR), lambda i, j, k: (0, 0)),    # gate expansion E
            ],
            out_specs=pl.BlockSpec((TM, TN), lambda i, j, k: (i, j)),
            scratch_shapes=[pltpu.VMEM((TM, TN), jnp.float32),
                            pltpu.VMEM((TM, KR), jnp.float32)],
        ),
        compiler_params=pltpu.CompilerParams(
            dimension_semantics=("parallel", "parallel", "arbitrary"),
            vmem_limit_bytes=32 * 1024 * 1024,
        ),
    )(xp, wp, qap, qbp, tkwp, e_mat)

    return out[:B, :Hout]


def fused_linear_ref(x, fused_weight, qa_weights, qb_weights, top_k_weights, scaling_factor):
    out = jnp.einsum('bh,oh->bo', x, fused_weight)
    a = jnp.einsum('bh,krh->bkr', x, qa_weights)
    b = jnp.einsum('bkr,khr->bkh', a, qb_weights)
    mix = jnp.sum(b * top_k_weights[:, :, None], axis=1)
    return out + scaling_factor[None] * mix


if __name__ == "__main__":
    # small shapes consistent with the module
    B, Hin, Hout, rank, n_fused = 8, 32, 32, 8, 4

    key = jax.random.PRNGKey(0)
    k1, k2, k3, k4, k5 = jax.random.split(key, 5)

    x = jax.random.normal(k1, (B, Hin), dtype=jnp.float32)
    top_k_weights = jax.nn.softmax(
        jax.random.normal(k2, (B, n_fused), dtype=jnp.float32), axis=-1)

    # module __init__ uses zeros for the mixture adapters; use small random
    # values so the adapter path is actually exercised, 0.1 scaling as in __init__.
    fused_weight = jax.random.normal(k3, (Hout, Hin), dtype=jnp.float32) * 0.02
    qa_weights = jax.random.normal(k4, (n_fused, rank, Hin), dtype=jnp.float32) * 0.02
    qb_weights = jax.random.normal(k5, (n_fused, Hout, rank), dtype=jnp.float32) * 0.02
    scaling_factor = jnp.full((Hout,), 0.1, dtype=jnp.float32)

    out = fused_linear(x, fused_weight, qa_weights, qb_weights,
                       top_k_weights, scaling_factor)
    out = jax.block_until_ready(out)

    ref = fused_linear_ref(x, fused_weight, qa_weights, qb_weights,
                           top_k_weights, scaling_factor)
    assert out.shape == (B, Hout)
    assert jnp.allclose(out, ref, atol=1e-5, rtol=1e-5), "mismatch vs reference"

    print("KERNEL_OK")
</pallas_src>

<mosaic_0001>
module attributes {stable_mosaic.version = 11 : i64} {
  func.func @fused_linear_kernel(%arg0: i32, %arg1: i32, %arg2: i32, %arg3: memref<8x128xf32, #tpu.memory_space<vmem>>, %arg4: memref<128x128xf32, #tpu.memory_space<vmem>>, %arg5: memref<32x128xf32, #tpu.memory_space<vmem>>, %arg6: memref<32x128xf32, #tpu.memory_space<vmem>>, %arg7: memref<8x4xf32, #tpu.memory_space<vmem>>, %arg8: memref<4x32xf32, #tpu.memory_space<vmem>>, %arg9: memref<8x128xf32, #tpu.memory_space<vmem>>, %arg10: memref<8x128xf32, #tpu.memory_space<vmem>>, %arg11: memref<8x32xf32, #tpu.memory_space<vmem>>) attributes {dimension_semantics = [#tpu.dimension_semantics<parallel>, #tpu.dimension_semantics<parallel>, #tpu.dimension_semantics<arbitrary>], iteration_bounds = array<i64: 1, 1, 1>, scalar_prefetch = 0 : i64, scratch_operands = 2 : i64, tpu.core_type = #tpu.core_type<tc>, window_params = [{transform_indices = @transform_0, window_bounds = array<i64: 8, 128>}, {transform_indices = @transform_1, window_bounds = array<i64: 128, 128>}, {transform_indices = @transform_2, window_bounds = array<i64: 32, 128>}, {transform_indices = @transform_3, window_bounds = array<i64: 32, 128>}, {transform_indices = @transform_4, window_bounds = array<i64: 8, 4>}, {pipeline_mode = #tpu.pipeline_mode<synchronous>, transform_indices = @transform_5, window_bounds = array<i64: 4, 32>}, {transform_indices = @transform_6, window_bounds = array<i64: 8, 128>}]} {
    %c0_i32 = arith.constant 0 : i32
    %0 = arith.cmpi eq, %arg2, %c0_i32 : i32
    %1 = arith.extui %0 : i1 to i32
    %c0_i32_0 = arith.constant 0 : i32
    %2 = arith.cmpi ne, %1, %c0_i32_0 : i32
    scf.if %2 {
      %cst_17 = arith.constant 0.000000e+00 : f32
      %17 = vector.broadcast %cst_17 : f32 to vector<8x128xf32>
      %c0_18 = arith.constant 0 : index
      %c0_19 = arith.constant 0 : index
      %18 = vector.load %arg10[%c0_18, %c0_19] : memref<8x128xf32, #tpu.memory_space<vmem>>, vector<8x128xf32>
      tpu.vector_store %arg10[%c0_18, %c0_19], %17 {strides = array<i32>} : memref<8x128xf32, #tpu.memory_space<vmem>>, vector<8x128xf32>,
      %cst_20 = arith.constant 0.000000e+00 : f32
      %19 = vector.broadcast %cst_20 : f32 to vector<8x32xf32>
      %c0_21 = arith.constant 0 : index
      %c0_22 = arith.constant 0 : index
      %20 = vector.load %arg11[%c0_21, %c0_22] : memref<8x32xf32, #tpu.memory_space<vmem>>, vector<8x32xf32>
      tpu.vector_store %arg11[%c0_21, %c0_22], %19 {strides = array<i32>} : memref<8x32xf32, #tpu.memory_space<vmem>>, vector<8x32xf32>,
    } else {
    }
    %c0 = arith.constant 0 : index
    %c0_1 = arith.constant 0 : index
    %3 = vector.load %arg3[%c0, %c0_1] : memref<8x128xf32, #tpu.memory_space<vmem>>, vector<8x128xf32>
    %c0_2 = arith.constant 0 : index
    %c0_3 = arith.constant 0 : index
    %4 = vector.load %arg10[%c0_2, %c0_3] : memref<8x128xf32, #tpu.memory_space<vmem>>, vector<8x128xf32>
    %c0_4 = arith.constant 0 : index
    %c0_5 = arith.constant 0 : index
    %5 = vector.load %arg4[%c0_4, %c0_5] : memref<128x128xf32, #tpu.memory_space<vmem>>, vector<128x128xf32>
    %cst = arith.constant dense<0.000000e+00> : vector<8x128xf32>
    %6 = tpu.matmul %3, %5, %cst {dimension_numbers = #tpu.dot_dimension_numbers<[1], [1], [0], [0], [0, 0, 1, 0], [], []>} : vector<8x128xf32>, vector<128x128xf32>, vector<8x128xf32> -> vector<8x128xf32>
    %7 = arith.addf %4, %6 : vector<8x128xf32>
    %c0_6 = arith.constant 0 : index
    %c0_7 = arith.constant 0 : index
    %8 = vector.load %arg10[%c0_6, %c0_7] : memref<8x128xf32, #tpu.memory_space<vmem>>, vector<8x128xf32>
    tpu.vector_store %arg10[%c0_6, %c0_7], %7 {strides = array<i32>} : memref<8x128xf32, #tpu.memory_space<vmem>>, vector<8x128xf32>,
    %c0_8 = arith.constant 0 : index
    %c0_9 = arith.constant 0 : index
    %9 = vector.load %arg11[%c0_8, %c0_9] : memref<8x32xf32, #tpu.memory_space<vmem>>, vector<8x32xf32>
    %c0_10 = arith.constant 0 : index
    %c0_11 = arith.constant 0 : index
    %10 = vector.load %arg5[%c0_10, %c0_11] : memref<32x128xf32, #tpu.memory_space<vmem>>, vector<32x128xf32>
    %cst_12 = arith.constant dense<0.000000e+00> : vector<8x32xf32>
    %11 = tpu.matmul %3, %10, %cst_12 {dimension_numbers = #tpu.dot_dimension_numbers<[1], [1], [0], [0], [0, 0, 1, 0], [], []>} : vector<8x128xf32>, vector<32x128xf32>, vector<8x32xf32> -> vector<8x32xf32>
    %12 = arith.addf %9, %11 : vector<8x32xf32>
    %c0_13 = arith.constant 0 : index
    %c0_14 = arith.constant 0 : index
    %13 = vector.load %arg11[%c0_13, %c0_14] : memref<8x32xf32, #tpu.memory_space<vmem>>, vector<8x32xf32>
    tpu.vector_store %arg11[%c0_13, %c0_14], %12 {strides = array<i32>} : memref<8x32xf32, #tpu.memory_space<vmem>>, vector<8x32xf32>,
    %c0_i32_15 = arith.constant 0 : i32
    %14 = arith.cmpi eq, %arg2, %c0_i32_15 : i32
    %15 = arith.extui %14 : i1 to i32
    %c0_i32_16 = arith.constant 0 : i32
    %16 = arith.cmpi ne, %15, %c0_i32_16 : i32
    scf.if %16 {
      %c0_17 = arith.constant 0 : index
      %c0_18 = arith.constant 0 : index
      %17 = vector.load %arg7[%c0_17, %c0_18] : memref<8x4xf32, #tpu.memory_space<vmem>>, vector<8x4xf32>
      %c0_19 = arith.constant 0 : index
      %c0_20 = arith.constant 0 : index
      %18 = vector.load %arg8[%c0_19, %c0_20] : memref<4x32xf32, #tpu.memory_space<vmem>>, vector<4x32xf32>
      %cst_21 = arith.constant dense<0.000000e+00> : vector<8x32xf32>
      %19 = tpu.matmul %17, %18, %cst_21 {dimension_numbers = #tpu.dot_dimension_numbers<[1], [0], [0], [1], [0, 0, 1, 1], [], []>} : vector<8x4xf32>, vector<4x32xf32>, vector<8x32xf32> -> vector<8x32xf32>
      %c0_22 = arith.constant 0 : index
      %c0_23 = arith.constant 0 : index
      %20 = vector.load %arg11[%c0_22, %c0_23] : memref<8x32xf32, #tpu.memory_space<vmem>>, vector<8x32xf32>
      %21 = arith.mulf %20, %19 : vector<8x32xf32>
      %c0_24 = arith.constant 0 : index
      %c0_25 = arith.constant 0 : index
      %22 = vector.load %arg6[%c0_24, %c0_25] : memref<32x128xf32, #tpu.memory_space<vmem>>, vector<32x128xf32>
      %cst_26 = arith.constant dense<0.000000e+00> : vector<8x128xf32>
      %23 = tpu.matmul %21, %22, %cst_26 {dimension_numbers = #tpu.dot_dimension_numbers<[1], [0], [0], [1], [0, 0, 1, 1], [], []>} : vector<8x32xf32>, vector<32x128xf32>, vector<8x128xf32> -> vector<8x128xf32>
      %c0_27 = arith.constant 0 : index
      %c0_28 = arith.constant 0 : index
      %24 = vector.load %arg10[%c0_27, %c0_28] : memref<8x128xf32, #tpu.memory_space<vmem>>, vector<8x128xf32>
      %25 = arith.addf %24, %23 : vector<8x128xf32>
      %c0_29 = arith.constant 0 : index
      %c0_30 = arith.constant 0 : index
      %26 = vector.load %arg9[%c0_29, %c0_30] : memref<8x128xf32, #tpu.memory_space<vmem>>, vector<8x128xf32>
      tpu.vector_store %arg9[%c0_29, %c0_30], %25 {strides = array<i32>} : memref<8x128xf32, #tpu.memory_space<vmem>>, vector<8x128xf32>,
    } else {
    }
    return
  }
  func.func @transform_0(%arg0: i32, %arg1: i32, %arg2: i32) -> (i32, i32) {
    %c0_i32 = arith.constant 0 : i32
    return %arg0, %arg2 : i32, i32
  }
  func.func @transform_1(%arg0: i32, %arg1: i32, %arg2: i32) -> (i32, i32) {
    %c0_i32 = arith.constant 0 : i32
    return %arg1, %arg2 : i32, i32
  }
  func.func @transform_2(%arg0: i32, %arg1: i32, %arg2: i32) -> (i32, i32) {
    %c0_i32 = arith.constant 0 : i32
    %c0_i32_0 = arith.constant 0 : i32
    return %c0_i32, %arg2 : i32, i32
  }
  func.func @transform_3(%arg0: i32, %arg1: i32, %arg2: i32) -> (i32, i32) {
    %c0_i32 = arith.constant 0 : i32
    %c0_i32_0 = arith.constant 0 : i32
    return %c0_i32, %arg1 : i32, i32
  }
  func.func @transform_4(%arg0: i32, %arg1: i32, %arg2: i32) -> (i32, i32) {
    %c0_i32 = arith.constant 0 : i32
    %c0_i32_0 = arith.constant 0 : i32
    return %arg0, %c0_i32 : i32, i32
  }
  func.func @transform_5(%arg0: i32, %arg1: i32, %arg2: i32) -> (i32, i32) {
    %c0_i32 = arith.constant 0 : i32
    %c0_i32_0 = arith.constant 0 : i32
    %c0_i32_1 = arith.constant 0 : i32
    return %c0_i32, %c0_i32_0 : i32, i32
  }
  func.func @transform_6(%arg0: i32, %arg1: i32, %arg2: i32) -> (i32, i32) {
    %c0_i32 = arith.constant 0 : i32
    return %arg0, %arg1 : i32, i32
  }
}

</mosaic_0001>

<bundles_post_ra>
// kernel: tpu_custom_call.1
= control target key start
LH: loop header
LB: loop body
LE: loop exit
PB: predicated region body
PF: predicated region fallthrough
CT: control target
= control target key end

     0   :  { %11 = vsyncpa [#allocation5], 0  ;;  %s791_s0 = inlined_call_operand.vmem [shape: f32[8,128], index: 0, kind: input, shape index: {}]   ;;  %s792_s1 = inlined_call_operand.hbm [shape: f32[128,128], index: 1, kind: input, shape index: {}]   ;;  %s793_s2 = inlined_call_operand.hbm [shape: f32[32,128], index: 2, kind: input, shape index: {}]   ;;  %s794_s3 = inlined_call_operand.hbm [shape: f32[32,128], index: 3, kind: input, shape index: {}]   ;;  %s795_s4 = inlined_call_operand.vmem [shape: f32[8,4], index: 4, kind: input, shape index: {}]   ;;  %s796_s5 = inlined_call_operand.vmem [shape: f32[4,32], index: 5, kind: input, shape index: {}]   ;;  %s797_s6 = inlined_call_operand.hbm [shape: f32[8,128], index: 6, kind: output, shape index: {}]  }
   0x1   :  { %12 = vsyncpa [#allocation8], 0 }
   0x2   :  { %13 = vsyncpa [#allocation6], 0  ;;  %s655_s21 = smov [#allocation7]   ;;  %s656_s23 = smov [#allocation4]  }
   0x3   :  { %s33_s22 = sshll.u32 %s655_s21, 4  ;;  %s21_s24 = sshll.u32 %s656_s23, 4  ;;  %s34_s22 = int_to_ptr.vmem [resolvable:$true] %s33_s22  ;;  %s699_s24 = int_to_ptr.vmem [resolvable:$true] %s21_s24 }
   0x4   :  { %s561_s27 = scalar_lea.hbm %s793_s2, 512 }
   0x5   :  { %p562_p0 = scmp.ne.s32.totalorder %s793_s2, %s561_s27  ;;  %p565_p1 = scmp.lt.u32.totalorder %s561_s27, %s793_s2 }
   0x7   :  { %p567_p2 = pnand %p565_p1, %p562_p0 }
   0x9   :  { %570 = shalt.err (!%p567_p2)
}
   0xa   :  { %s571_s8 = scalar_lea.vmem %s34_s22, 512  ;;  %p576_p4 = scmp.lt.s32.totalorder %s34_s22, %s34_s22 }
   0xb   :  { %p572_p3 = scmp.ne.s32.totalorder %s34_s22, %s571_s8  ;;  %p577_p5 = scmp.lt.s32.totalorder %s571_s8, %s571_s8 }
   0xd   :  { %p578_p6 = por %p577_p5, %p576_p4 }
   0xf   :  { %p579_p7 = pnand %p578_p6, %p572_p3 }
  0x11   :  { %582 = shalt.err (!%p579_p7)
}
  0x12   :  { %s657_s9 = smov 128   ;;  %s658_s10 = smov 8  }
  0x13   :  { %39 = dma.hbm_to_vmem [thread:$0]  %s793_s2, 512, %s34_s22, [#allocation8], %s657_s9, %s657_s9, %s658_s10  }
  0x14   :  { %s583_s15 = scalar_lea.hbm %s792_s1, 2048 }
  0x15   :  { %p584_p8 = scmp.ne.s32.totalorder %s792_s1, %s583_s15  ;;  %p587_p9 = scmp.lt.u32.totalorder %s583_s15, %s792_s1 }
  0x17   :  { %p589_p10 = pnand %p587_p9, %p584_p8 }
  0x19   :  { %592 = shalt.err (!%p589_p10)
}
  0x1a   :  { %s593_s20 = scalar_lea.vmem %s699_s24, 2048  ;;  %p598_p12 = scmp.lt.s32.totalorder %s699_s24, %s699_s24 }
  0x1b   :  { %p594_p11 = scmp.ne.s32.totalorder %s699_s24, %s593_s20  ;;  %p599_p13 = scmp.lt.s32.totalorder %s593_s20, %s593_s20 }
  0x1d   :  { %p600_p0 = por %p599_p13, %p598_p12 }
  0x1f   :  { %p601_p1 = pnand %p600_p0, %p594_p11 }
  0x21   :  { %604 = shalt.err (!%p601_p1)
}
  0x22   :  { %27 = dma.hbm_to_vmem [thread:$0]  %s792_s1, 2048, %s699_s24, [#allocation5], %s657_s9, %s657_s9, %s658_s10  }
  0x23   :  { %s659_s22 = smov [#allocation9]   ;;  %s605_s27 = scalar_lea.hbm %s794_s3, 512 }
  0x24   :  { %s45_s23 = sshll.u32 %s659_s22, 4  ;;  %p606_p2 = scmp.ne.s32.totalorder %s794_s3, %s605_s27  ;;  %s46_s23 = int_to_ptr.vmem [resolvable:$true] %s45_s23 }
  0x25   :  { %p609_p3 = scmp.lt.u32.totalorder %s605_s27, %s794_s3 }
  0x27   :  { %p611_p4 = pnand %p609_p3, %p606_p2 }
  0x29   :  { %614 = shalt.err (!%p611_p4)
}
  0x2a   :  { %s615_s8 = scalar_lea.vmem %s46_s23, 512  ;;  %p620_p6 = scmp.lt.s32.totalorder %s46_s23, %s46_s23 }
  0x2b   :  { %p616_p5 = scmp.ne.s32.totalorder %s46_s23, %s615_s8  ;;  %p621_p7 = scmp.lt.s32.totalorder %s615_s8, %s615_s8 }
  0x2d   :  { %p622_p8 = por %p621_p7, %p620_p6 }
  0x2f   :  { %p623_p9 = pnand %p622_p8, %p616_p5 }
  0x31   :  { %626 = shalt.err (!%p623_p9)
}
  0x32   :  { %51 = dma.hbm_to_vmem [thread:$0]  %s794_s3, 512, %s46_s23, [#allocation8], %s657_s9, %s657_s9, %s658_s10  }
  0x33   :  { %649 = dma.done.wait [#allocation5], 2048  }
  0x34   :  { %650 = vsyncadd [#allocation5], 4294965248 }
  0x35   :  { %651 = dma.done.wait [#allocation8], 1024  }
  0x36   :  { %652 = vsyncadd [#allocation8], 4294966272  ;;  %v660_v0 = vmov 0.0|0.0   ;;  %vm661_vm0 = vmmov 0   ;;  %v662_v1 = vmov 0.0   ;;  %vm70_vm1 = vcmask 261120  }
  0x37   :  { %539 = vmatprep.subr.bf16.mxu1 %v660_v0  ;;  %496 = vmatprep.mubr.msk.f32.mxu1 %vm661_vm0, %v662_v1  ;;  %71 = vst.msk [vmem:[#allocation3] sm:$0xff] %vm70_vm1, %v662_v1  ;;  %v163_v2 = vld [vmem:[#allocation7] sm:$0xff]  ;;  %v164_v3 = vld [vmem:[#allocation7 + $0x8] sm:$0xff]  ;;  %v165_v8 = vld [vmem:[#allocation7 + $0x10] sm:$0xff]  ;;  %vm249_vm2 = vcmask 1043456   ;;  %vm245_vm3 = vcmask 31744  }
  0x38   :  { %515 = vmatprep.subr.bf16.mxu0 %v660_v0  ;;  %485 = vmatprep.mubr.msk.f32.mxu0 %vm661_vm0, %v662_v1  ;;  %v540_v4 = vpack.c.bf16 %v164_v3, %v163_v2  ;;  %v74_v5 = vld [vmem:[#allocation4] sm:$0xff]  ;;  %v75_v6 = vld [vmem:[#allocation4 + $0x8] sm:$0xff]  ;;  %v166_v9 = vld [vmem:[#allocation7 + $0x18] sm:$0xff] }
  0x39   :  { %v516_v7 = vpack.c.bf16 %v75_v6, %v74_v5  ;;  %v76_v10 = vld [vmem:[#allocation4 + $0x10] sm:$0xff]  ;;  %v77_v11 = vld [vmem:[#allocation4 + $0x18] sm:$0xff]  ;;  %v543_v12 = vpack.c.bf16 %v166_v9, %v165_v8  ;;  %v78_v14 = vld [vmem:[#allocation4 + $0x20] sm:$0xff] }
  0x3a   :  { %541 = vmatpush3.bf16.xpose.msra.mxu1 %v540_v4  ;;  %v519_v13 = vpack.c.bf16 %v77_v11, %v76_v10  ;;  %v79_v15 = vld [vmem:[#allocation4 + $0x28] sm:$0xff]  ;;  %v72_v16 = vld [vmem:[%s791_s0] sm:$0xff]  ;;  %v80_v20 = vld [vmem:[#allocation4 + $0x30] sm:$0xff]  ;;  %s663_s0 = smov [#allocation10]  }
  0x3b   :  { %542 = vmatprep.subr.bf16.mxu1 %v660_v0  ;;  %517 = vmatpush3.bf16.xpose.msra.mxu0 %v516_v7  ;;  %v244_v17 = vld [vmem:[%s796_s5] sm:$0xf]  ;;  %v522_v18 = vpack.c.bf16 %v79_v15, %v78_v14  ;;  %v82_v23 = vld [vmem:[#allocation4 + $0x40] sm:$0xff]  ;;  %v83_v24 = vld [vmem:[#allocation4 + $0x48] sm:$0xff] }
  0x3c   :  { %518 = vmatprep.subr.bf16.mxu0 %v660_v0  ;;  %v243_v19 = vld [vmem:[%s795_s4] sm:$0xff]  ;;  %v528_v25 = vpack.c.bf16 %v83_v24, %v82_v23  ;;  %v84_v26 = vld [vmem:[#allocation4 + $0x50] sm:$0xff]  ;;  %v86_v29 = vld [vmem:[#allocation4 + $0x60] sm:$0xff]  ;;  %s411_s4 = sshll.u32 %s663_s0, 4  ;;  %s412_s4 = int_to_ptr.vmem [resolvable:$true] %s411_s4 }
  0x3d   :  { %v81_v21 = vld [vmem:[#allocation4 + $0x38] sm:$0xff]  ;;  %v87_v30 = vld [vmem:[#allocation4 + $0x68] sm:$0xff]  ;;  %v88_v32 = vld [vmem:[#allocation4 + $0x70] sm:$0xff]  ;;  %s627_s5 = scalar_lea.vmem %s412_s4, 128  ;;  %p632_p11 = scmp.lt.s32.totalorder %s412_s4, %s412_s4 }
  0x3e   :  { %v525_v22 = vpack.c.bf16 %v81_v21, %v80_v20  ;;  %v85_v27 = vld [vmem:[#allocation4 + $0x58] sm:$0xff]  ;;  %v534_v31 = vpack.c.bf16 %v87_v30, %v86_v29  ;;  %v325_v35 = vld [vmem:[#allocation9] sm:$0xff]  ;;  %v326_v36 = vld [vmem:[#allocation9 + $0x8] sm:$0xff]  ;;  %p628_p10 = scmp.ne.s32.totalorder %s412_s4, %s627_s5  ;;  %p633_p12 = scmp.lt.s32.totalorder %s627_s5, %s627_s5 }
  0x3f   :  { %v531_v28 = vpack.c.bf16 %v85_v27, %v84_v26  ;;  %v89_v33 = vld [vmem:[#allocation4 + $0x78] sm:$0xff]  ;;  %v546_v37 = vpack.c.bf16 %v326_v36, %v325_v35  ;;  %v327_v38 = vld [vmem:[#allocation9 + $0x10] sm:$0xff] }
  0x40   :  { %v537_v34 = vpack.c.bf16 %v89_v33, %v88_v32  ;;  %v328_v39 = vld [vmem:[#allocation9 + $0x18] sm:$0xff]  ;;  %p634_p13 = por %p633_p12, %p632_p11 }
  0x41   :  { %v549_v40 = vpack.c.bf16 %v328_v39, %v327_v38  ;;  %v162_v41 = vld [vmem:[#allocation3] sm:$0xff] }
  0x42   :  { %544 = vmatpush3.bf16.xpose.msra.mxu1 %v543_v12  ;;  %p635_p0 = pnand %p634_p13, %p628_p10 }
  0x43   :  { %499 = vmatprep.subr.mxu1 %v662_v1  ;;  %520 = vmatpush3.bf16.xpose.msra.mxu0 %v519_v13 }
  0x44   :  { %521 = vmatprep.subr.bf16.mxu0 %v660_v0 }
  0x49   :  { %497 = vmatmul.mubr.f32.vlgmr.msra.gmra.mrb[0].mxu1 %v72_v16 }
  0x4a   :  { %500 = vmatpush3.msk.msra.mxu1 %vm249_vm2, %v244_v17  ;;  %501 = vmatprep.mubr.msk.f32.mxu1 %vm661_vm0, %v662_v1 }
  0x4b   :  { %545 = vmatprep.subr.bf16.mxu1 %v660_v0  ;;  %523 = vmatpush3.bf16.xpose.msra.mxu0 %v522_v18 }
  0x4c   :  { %524 = vmatprep.subr.bf16.mxu0 %v660_v0 }
  0x4d   :  { %502 = vmatmul.mubr.msk.f32.vlgmr.msra.gmra.mrb[2].mxu1 %vm245_vm3, %v243_v19 }
  0x4e   :  { %512 = vmatprep.mubr.msk.f32.mxu1 %vm661_vm0, %v662_v1  ;;  %547 = vmatpush3.bf16.msra.mxu1 %v546_v37 }
  0x4f   :  { %548 = vmatprep.subr.bf16.mxu1 %v660_v0 }
  0x52   :  { %550 = vmatpush3.bf16.msra.mxu1 %v549_v40 }
  0x53   :  { %526 = vmatpush3.bf16.xpose.msra.mxu0 %v525_v22 }
  0x54   :  { %527 = vmatprep.subr.bf16.mxu0 %v660_v0 }
  0x5b   :  { %529 = vmatpush3.bf16.xpose.msra.mxu0 %v528_v25 }
  0x5c   :  { %530 = vmatprep.subr.bf16.mxu0 %v660_v0 }
  0x63   :  { %532 = vmatpush3.bf16.xpose.msra.mxu0 %v531_v28 }
  0x64   :  { %533 = vmatprep.subr.bf16.mxu0 %v660_v0 }
  0x6b   :  { %535 = vmatpush3.bf16.xpose.msra.mxu0 %v534_v31 }
  0x6c   :  { %536 = vmatprep.subr.bf16.mxu0 %v660_v0 }
  0x73   :  { %538 = vmatpush3.bf16.xpose.msra.mxu0 %v537_v34 }
  0x7a   :  { %486 = vmatmul.mubr.f32.vlgmr.msra.gmra.mrb[0].mxu0 %v72_v16 }
 0x11c   :  { %v233_v42 = vpop.f32.mrb[0].mxu1 }
 0x11d   :  { %v237_v43 = vadd.f32 %v233_v42, %v162_v41  ;;  %v498_v44 = vpop.f32.mrb[1].mxu1 }
 0x11f   :  { %239 = vst.msk [vmem:[#allocation3] sm:$0xff] %vm70_vm1, %v237_v43 }
 0x120   :  { %v319_v45 = vpop.f32.mrb[2].mxu1 }
 0x121   :  { %v503_v46 = vpop.f32.mrb[3].mxu1 }
 0x126   :  { %v323_v47 = vld [vmem:[#allocation3] sm:$0xff] }
 0x127   :  { %v324_v48 = vmul.f32 %v323_v47, %v319_v45 }
 0x129   :  { %513 = vmatmul.mubr.msk.f32.vlgmr.msra.gmra.mrb[4].mxu1 %vm70_vm1, %v324_v48 }
 0x14d   :  { %v156_v49 = vpop.f32.mrb[0].mxu0 }
 0x14e   :  { %v487_v50 = vpop.f32.mrb[1].mxu0 }
 0x1fc   :  { %v398_v51 = vpop.f32.mrb[4].mxu1 }
 0x1fd   :  { %v403_v52 = vadd.f32 %v398_v51, %v156_v49  ;;  %v514_v53 = vpop.f32.mrb[5].mxu1 }
 0x1ff   :  { %404 = vst [vmem:[#allocation10] sm:$0xff] %v403_v52 }
 0x200   :  { %638 = shalt.err (!%p635_p0)
}
 0x201   :  { %s639_s16 = scalar_lea.hbm %s797_s6, 128 }
 0x202   :  { %p640_p1 = scmp.ne.s32.totalorder %s797_s6, %s639_s16  ;;  %p643_p2 = scmp.lt.u32.totalorder %s639_s16, %s797_s6 }
 0x204   :  { %p645_p3 = pnand %p643_p2, %p640_p1 }
 0x206   :  { %648 = shalt.err (!%p645_p3)
}
 0x207   :  { %414 = dma.vmem_to_hbm [thread:$0]  %s412_s4, 128, %s797_s6, [#allocation6]  }
 0x208   :  { %653 = dma.done.wait [#allocation6], 128  }
 0x209   :  { %654 = vsyncadd [#allocation6], 4294967168 }
 0x20a   :  { %418 = vsyncpa [#allocation5], 1 }
 0x20b   :  { %419 = vsyncpa [#allocation8], 1 }
 0x20c   :  { %420 = vsyncpa [#allocation6], 1 }

</bundles_post_ra>
